<compile_context>
chip_gen: v6e
topology: v6e:2x2x1
jax: 0.10.0
libtpu: 0.0.40
codegen_flags: <defaults>
</compile_context>

<pallas_src>
import functools
import math

import jax
import jax.numpy as jnp
from jax.experimental import pallas as pl
from jax.experimental.pallas import tpu as pltpu


# --------------------------------------------------------------------------- #
# Trace-time helpers
# --------------------------------------------------------------------------- #
def _round_up(x, m):
    return ((x + m - 1) // m) * m


def _cdiv(a, b):
    return -(-a // b)


def _intpow(x, k):
    """x**k for a compile-time integer k >= 1, lowered as a VPU mul chain."""
    assert k >= 1
    y = x
    for _ in range(k - 1):
        y = y * x
    return y


def _pow_table(x, ks):
    """{k: x**k} for every k in ks (k >= 1), built as one incremental mul chain."""
    table = {}
    if not ks:
        return table
    cur = x
    table[1] = cur
    for k in range(2, max(ks) + 1):
        cur = cur * x
        table[k] = cur
    return {k: table[k] for k in ks}


def _choose_split(batch, feat):
    """Split each row into G contiguous sub-rows so batch*G fills the 8-sublane
    vreg granularity (row sums are invariant to the split)."""
    if batch % 8 == 0:
        return 1
    g = 8 // math.gcd(batch, 8)
    if feat % g == 0 and (feat // g) >= 128:
        return g
    return 1


@functools.lru_cache(maxsize=1)
def _vmem_capacity_bytes():
    """Per-core VMEM capacity; conservative (v7x-safe) fallback if the query fails."""
    try:
        return int(pltpu.get_tpu_info().vmem_capacity_bytes)
    except Exception:
        return 64 * 1024 * 1024


def _choose_tiling(ns, bg_pad, itemsize, block_budget_bytes, min_tiles):
    """Return (TN, num_tiles, ns_pad): lane-dense tiles of width TN (multiple of
    128), num_tiles of them (a multiple of min_tiles), padded feature length
    ns_pad = num_tiles * TN >= ns.  Each input block stays <= block_budget_bytes."""
    lanes_budget = max(128, (block_budget_bytes // (bg_pad * itemsize)) // 128 * 128)
    num = max(min_tiles, _cdiv(ns, lanes_budget))
    num = _round_up(num, min_tiles)
    tn = _round_up(_cdiv(ns, num), 128)
    return tn, num, num * tn


# --------------------------------------------------------------------------- #
# Kernel
# --------------------------------------------------------------------------- #
def _at_moments_kernel(t_ref, s_ref, out_ref, *, p, pairs):
    """grid = (split, layer, feature_tile).

    t_ref / s_ref : (1, BG, TN) tile of one layer's flattened activations.
    out_ref       : (1, M, BG, 1) per-(split, layer) moment sums; stays resident
                    in VMEM across the feature_tile axis (accumulator).
    """
    n = pl.program_id(2)

    @pl.when(n == 0)
    def _init():
        out_ref[...] = jnp.zeros_like(out_ref)

    s = s_ref[0]
    t = t_ref[0]
    if s.dtype != jnp.float32:          # single upcast, only when needed
        s = s.astype(jnp.float32)
        t = t.astype(jnp.float32)

    a = _intpow(s, p)                   # student activation ** p
    b = _intpow(t, p)                   # teacher activation ** p

    # Shared power tables: each required a^k / b^k is computed exactly once.
    apow = _pow_table(a, sorted({ka for ka, _ in pairs if ka > 0}))
    bpow = _pow_table(b, sorted({kb for _, kb in pairs if kb > 0}))

    # Per-moment lane reduction -> narrow (BG, 1) accumulate into the output.
    for m, (ka, kb) in enumerate(pairs):
        if ka == 0:
            term = bpow[kb]
        elif kb == 0:
            term = apow[ka]
        else:
            term = apow[ka] * bpow[kb]
        out_ref[0, m] += jnp.sum(term, axis=-1, keepdims=True)


# --------------------------------------------------------------------------- #
# Wrapper
# --------------------------------------------------------------------------- #
@functools.partial(jax.jit, static_argnames=("p",))
def at_loss(teacher, student, p=2):
    """teacher, student: (L, B, ...) stacks of per-layer activations.
    (For a Python list of differently-shaped layers, sum at_loss(t[None], s[None], p)
    over the layers — moment sums are per-layer independent.)"""
    assert teacher.shape == student.shape
    assert isinstance(p, int) and p >= 1, "norm_type must be a positive integer"
    # TODO(synk): non-integer norm_type would need a transcendental |x|^p (EUP) path.

    eps = 1e-12                                    # F.normalize default
    L, B = teacher.shape[0], teacher.shape[1]
    N = math.prod(teacher.shape[2:])

    # Moments needed: (2,0)/(0,2) for the two row norms plus the binomial
    # expansion of sum_j (a_j/||a|| - b_j/||b||)^p with a = s^p, b = t^p.
    pairs = []
    for pair in [(2, 0), (0, 2)] + [(k, p - k) for k in range(p + 1)]:
        if pair not in pairs:
            pairs.append(pair)
    pairs = tuple(pairs)
    M = len(pairs)

    # Small-batch sublane fill (free metadata reshape).
    G = _choose_split(B, N)
    BG = B * G
    Ns = N // G
    bg_pad = _round_up(BG, 8)
    itemsize = jnp.dtype(teacher.dtype).itemsize

    # Generation-aware VMEM budget: 2 inputs x 2 pipeline buffers per grid step
    # plus headroom (the narrow output block is negligible).
    vmem_cap = _vmem_capacity_bytes()
    vmem_limit = max(32 << 20, min(int(vmem_cap * 0.75), vmem_cap - (8 << 20)))
    block_budget = min(16 << 20, max(512 << 10, vmem_limit // 6))

    # Megacore: if the layer axis alone cannot balance the two v7x TensorCores,
    # split the feature range into two "parallel" halves (moments are associative).
    split = 2 if (L % 2 == 1 and Ns >= 256) else 1

    TN, num_n, Ns_pad = _choose_tiling(Ns, bg_pad, itemsize, block_budget, split)
    num_per = num_n // split

    t = teacher.reshape(L, BG, Ns)
    s = student.reshape(L, BG, Ns)
    if Ns_pad != Ns:
        # Zero padding is exact: every moment term has power >= 1 in at least one
        # operand, so padded positions contribute nothing to any accumulated sum.
        pad = ((0, 0), (0, 0), (0, Ns_pad - Ns))
        t = jnp.pad(t, pad)
        s = jnp.pad(s, pad)

    kernel = functools.partial(_at_moments_kernel, p=p, pairs=pairs)
    # TODO(synk): optionally sweep pipeline_mode=pl.Buffered(3) on the input specs
    # (a few % on a mem-bound stream) once validated against the VMEM budget.
    moments = pl.pallas_call(
        kernel,
        out_shape=jax.ShapeDtypeStruct((split * L, M, BG, 1), jnp.float32),
        grid=(split, L, num_per),
        in_specs=[
            pl.BlockSpec((1, BG, TN), lambda sp, l, n: (l, 0, sp * num_per + n)),
            pl.BlockSpec((1, BG, TN), lambda sp, l, n: (l, 0, sp * num_per + n)),
        ],
        out_specs=pl.BlockSpec((1, M, BG, 1), lambda sp, l, n: (sp * L + l, 0, 0, 0)),
        compiler_params=pltpu.CompilerParams(
            dimension_semantics=("parallel", "parallel", "arbitrary"),
            vmem_limit_bytes=vmem_limit,
        ),
    )(t, s)

    # Tiny epilogue on split*L*M*B*G scalars: combine split halves / sub-rows,
    # clamp-normalize, binomial-combine, mean over (B, N), sum layers.
    # TODO(synk): when student ~= teacher the signed moment combine can cancel
    # catastrophically in f32; a direct (sn - tn)^p streaming pass is the
    # numerically safe (but 2x-traffic) alternative for late-training use.
    moments = moments[..., 0].reshape(split, L, M, B, G).sum(axis=(0, 4))  # (L, M, B)
    mom = {pair: moments[:, i] for i, pair in enumerate(pairs)}
    ns_ = jnp.maximum(jnp.sqrt(mom[(2, 0)]), eps)       # ||student^p||_2 per row
    nt_ = jnp.maximum(jnp.sqrt(mom[(0, 2)]), eps)       # ||teacher^p||_2 per row
    row = jnp.zeros((L, B), jnp.float32)
    for k in range(p + 1):
        coef = float(math.comb(p, k) * ((-1) ** (p - k)))
        row = row + coef * mom[(k, p - k)] / (ns_ ** k * nt_ ** (p - k))
    per_layer = jnp.sum(row, axis=-1) / float(B * N)
    return jnp.sum(per_layer)


def at_loss_ref(teacher, student, p=2):
    """Pure-JAX reference (mirrors the PyTorch module)."""
    L, B = teacher.shape[0], teacher.shape[1]
    t = (teacher.reshape(L, B, -1).astype(jnp.float32)) ** p
    s = (student.reshape(L, B, -1).astype(jnp.float32)) ** p
    tn = t / jnp.maximum(jnp.linalg.norm(t, axis=-1, keepdims=True), 1e-12)
    sn = s / jnp.maximum(jnp.linalg.norm(s, axis=-1, keepdims=True), 1e-12)
    return jnp.sum(jnp.mean((sn - tn) ** p, axis=(1, 2)))


if __name__ == "__main__":
    key = jax.random.PRNGKey(0)

    def _check(shape, p, dtype, kseed):
        kt, ks = jax.random.split(jax.random.fold_in(key, kseed))
        teacher = jax.random.normal(kt, shape, dtype=jnp.float32).astype(dtype)
        student = jax.random.normal(ks, shape, dtype=jnp.float32).astype(dtype)
        loss = at_loss(teacher, student, p=p)
        jax.block_until_ready(loss)
        loss_ref = at_loss_ref(teacher, student, p=p)
        assert jnp.allclose(loss, loss_ref, rtol=1e-4, atol=1e-6), (
            shape, p, dtype, loss, loss_ref)

    # Main config: L=2 layers, each activation (B=2, C=4, H=16, W=16).
    _check((2, 2, 4, 16, 16), p=2, dtype=jnp.float32, kseed=0)
    # Odd layer count -> feature-split megacore path.
    _check((1, 2, 8, 16, 16), p=2, dtype=jnp.float32, kseed=1)
    # Ragged feature dim (N=105) -> zero-padding path; p=3 general binomial path.
    _check((3, 3, 3, 5, 7), p=3, dtype=jnp.float32, kseed=2)
    # bf16 inputs (in-kernel single upcast).
    _check((2, 4, 8, 8, 8), p=2, dtype=jnp.bfloat16, kseed=3)

    print("KERNEL_OK")
</pallas_src>

<mosaic_0001>
module attributes {stable_mosaic.version = 11 : i64} {
  func.func @_at_moments_kernel(%arg0: i32, %arg1: i32, %arg2: i32, %arg3: memref<1x8x256xf32, #tpu.memory_space<vmem>>, %arg4: memref<1x8x256xf32, #tpu.memory_space<vmem>>, %arg5: memref<1x3x8x1xf32, #tpu.memory_space<vmem>>) attributes {dimension_semantics = [#tpu.dimension_semantics<parallel>, #tpu.dimension_semantics<parallel>, #tpu.dimension_semantics<arbitrary>], iteration_bounds = array<i64: 1, 2, 1>, scalar_prefetch = 0 : i64, scratch_operands = 0 : i64, tpu.core_type = #tpu.core_type<tc>, window_params = [{transform_indices = @transform_0, window_bounds = array<i64: 1, 8, 256>}, {transform_indices = @transform_1, window_bounds = array<i64: 1, 8, 256>}, {transform_indices = @transform_2, window_bounds = array<i64: 1, 3, 8, 1>}]} {
    %c0_i32 = arith.constant 0 : i32
    %0 = arith.cmpi eq, %arg2, %c0_i32 : i32
    %1 = arith.extui %0 : i1 to i32
    %c0_i32_0 = arith.constant 0 : i32
    %2 = arith.cmpi ne, %1, %c0_i32_0 : i32
    scf.if %2 {
      %cst_30 = arith.constant 0.000000e+00 : f32
      %36 = vector.broadcast %cst_30 : f32 to vector<1x3x8x1xf32>
      %c0_31 = arith.constant 0 : index
      %c0_32 = arith.constant 0 : index
      %c0_33 = arith.constant 0 : index
      %c0_34 = arith.constant 0 : index
      %37 = vector.load %arg5[%c0_31, %c0_32, %c0_33, %c0_34] : memref<1x3x8x1xf32, #tpu.memory_space<vmem>>, vector<1x3x8x1xf32>
      tpu.vector_store %arg5[%c0_31, %c0_32, %c0_33, %c0_34], %36 {strides = array<i32>} : memref<1x3x8x1xf32, #tpu.memory_space<vmem>>, vector<1x3x8x1xf32>,
    } else {
    }
    %c0 = arith.constant 0 : index
    %c0_1 = arith.constant 0 : index
    %c0_2 = arith.constant 0 : index
    %3 = vector.load %arg4[%c0, %c0_1, %c0_2] : memref<1x8x256xf32, #tpu.memory_space<vmem>>, vector<1x8x256xf32>
    %4 = vector.shape_cast %3 : vector<1x8x256xf32> to vector<8x256xf32>
    %c0_3 = arith.constant 0 : index
    %c0_4 = arith.constant 0 : index
    %c0_5 = arith.constant 0 : index
    %5 = vector.load %arg3[%c0_3, %c0_4, %c0_5] : memref<1x8x256xf32, #tpu.memory_space<vmem>>, vector<1x8x256xf32>
    %6 = vector.shape_cast %5 : vector<1x8x256xf32> to vector<8x256xf32>
    %7 = arith.mulf %4, %4 : vector<8x256xf32>
    %8 = arith.mulf %6, %6 : vector<8x256xf32>
    %9 = arith.mulf %7, %7 : vector<8x256xf32>
    %10 = arith.mulf %8, %8 : vector<8x256xf32>
    %c0_6 = arith.constant 0 : index
    %c0_7 = arith.constant 0 : index
    %c0_8 = arith.constant 0 : index
    %c0_9 = arith.constant 0 : index
    %11 = vector.load %arg5[%c0_6, %c0_7, %c0_8, %c0_9] : memref<1x3x8x1xf32, #tpu.memory_space<vmem>>, vector<1x1x8x1xf32>
    %12 = vector.shape_cast %11 : vector<1x1x8x1xf32> to vector<8x1xf32>
    %cst = arith.constant dense<0.000000e+00> : vector<8xf32>
    %13 = vector.multi_reduction <add>, %9, %cst [1] : vector<8x256xf32> to vector<8xf32>
    %14 = vector.shape_cast %13 : vector<8xf32> to vector<8x1xf32>
    %15 = arith.addf %12, %14 : vector<8x1xf32>
    %c0_10 = arith.constant 0 : index
    %c0_11 = arith.constant 0 : index
    %c0_12 = arith.constant 0 : index
    %c0_13 = arith.constant 0 : index
    %16 = vector.load %arg5[%c0_10, %c0_11, %c0_12, %c0_13] : memref<1x3x8x1xf32, #tpu.memory_space<vmem>>, vector<1x1x8x1xf32>
    %17 = vector.shape_cast %16 : vector<1x1x8x1xf32> to vector<8x1xf32>
    %18 = vector.shape_cast %15 : vector<8x1xf32> to vector<1x1x8x1xf32>
    tpu.vector_store %arg5[%c0_10, %c0_11, %c0_12, %c0_13], %18 {strides = array<i32>} : memref<1x3x8x1xf32, #tpu.memory_space<vmem>>, vector<1x1x8x1xf32>,
    %c0_14 = arith.constant 0 : index
    %c1 = arith.constant 1 : index
    %c0_15 = arith.constant 0 : index
    %c0_16 = arith.constant 0 : index
    %19 = vector.load %arg5[%c0_14, %c1, %c0_15, %c0_16] : memref<1x3x8x1xf32, #tpu.memory_space<vmem>>, vector<1x1x8x1xf32>
    %20 = vector.shape_cast %19 : vector<1x1x8x1xf32> to vector<8x1xf32>
    %cst_17 = arith.constant dense<0.000000e+00> : vector<8xf32>
    %21 = vector.multi_reduction <add>, %10, %cst_17 [1] : vector<8x256xf32> to vector<8xf32>
    %22 = vector.shape_cast %21 : vector<8xf32> to vector<8x1xf32>
    %23 = arith.addf %20, %22 : vector<8x1xf32>
    %c0_18 = arith.constant 0 : index
    %c1_19 = arith.constant 1 : index
    %c0_20 = arith.constant 0 : index
    %c0_21 = arith.constant 0 : index
    %24 = vector.load %arg5[%c0_18, %c1_19, %c0_20, %c0_21] : memref<1x3x8x1xf32, #tpu.memory_space<vmem>>, vector<1x1x8x1xf32>
    %25 = vector.shape_cast %24 : vector<1x1x8x1xf32> to vector<8x1xf32>
    %26 = vector.shape_cast %23 : vector<8x1xf32> to vector<1x1x8x1xf32>
    tpu.vector_store %arg5[%c0_18, %c1_19, %c0_20, %c0_21], %26 {strides = array<i32>} : memref<1x3x8x1xf32, #tpu.memory_space<vmem>>, vector<1x1x8x1xf32>,
    %27 = arith.mulf %7, %8 : vector<8x256xf32>
    %c0_22 = arith.constant 0 : index
    %c2 = arith.constant 2 : index
    %c0_23 = arith.constant 0 : index
    %c0_24 = arith.constant 0 : index
    %28 = vector.load %arg5[%c0_22, %c2, %c0_23, %c0_24] : memref<1x3x8x1xf32, #tpu.memory_space<vmem>>, vector<1x1x8x1xf32>
    %29 = vector.shape_cast %28 : vector<1x1x8x1xf32> to vector<8x1xf32>
    %cst_25 = arith.constant dense<0.000000e+00> : vector<8xf32>
    %30 = vector.multi_reduction <add>, %27, %cst_25 [1] : vector<8x256xf32> to vector<8xf32>
    %31 = vector.shape_cast %30 : vector<8xf32> to vector<8x1xf32>
    %32 = arith.addf %29, %31 : vector<8x1xf32>
    %c0_26 = arith.constant 0 : index
    %c2_27 = arith.constant 2 : index
    %c0_28 = arith.constant 0 : index
    %c0_29 = arith.constant 0 : index
    %33 = vector.load %arg5[%c0_26, %c2_27, %c0_28, %c0_29] : memref<1x3x8x1xf32, #tpu.memory_space<vmem>>, vector<1x1x8x1xf32>
    %34 = vector.shape_cast %33 : vector<1x1x8x1xf32> to vector<8x1xf32>
    %35 = vector.shape_cast %32 : vector<8x1xf32> to vector<1x1x8x1xf32>
    tpu.vector_store %arg5[%c0_26, %c2_27, %c0_28, %c0_29], %35 {strides = array<i32>} : memref<1x3x8x1xf32, #tpu.memory_space<vmem>>, vector<1x1x8x1xf32>,
    return
  }
  func.func @transform_0(%arg0: i32, %arg1: i32, %arg2: i32) -> (i32, i32, i32) {
    %c1_i32 = arith.constant 1 : i32
    %0 = arith.muli %arg0, %c1_i32 : i32
    %1 = arith.addi %0, %arg2 : i32
    %c0_i32 = arith.constant 0 : i32
    %c0_i32_0 = arith.constant 0 : i32
    return %arg1, %c0_i32, %1 : i32, i32, i32
  }
  func.func @transform_1(%arg0: i32, %arg1: i32, %arg2: i32) -> (i32, i32, i32) {
    %c1_i32 = arith.constant 1 : i32
    %0 = arith.muli %arg0, %c1_i32 : i32
    %1 = arith.addi %0, %arg2 : i32
    %c0_i32 = arith.constant 0 : i32
    %c0_i32_0 = arith.constant 0 : i32
    return %arg1, %c0_i32, %1 : i32, i32, i32
  }
  func.func @transform_2(%arg0: i32, %arg1: i32, %arg2: i32) -> (i32, i32, i32, i32) {
    %c2_i32 = arith.constant 2 : i32
    %0 = arith.muli %arg0, %c2_i32 : i32
    %1 = arith.addi %0, %arg1 : i32
    %c0_i32 = arith.constant 0 : i32
    %c0_i32_0 = arith.constant 0 : i32
    %c0_i32_1 = arith.constant 0 : i32
    %c0_i32_2 = arith.constant 0 : i32
    return %1, %c0_i32, %c0_i32_0, %c0_i32_1 : i32, i32, i32, i32
  }
}

</mosaic_0001>

<bundles_post_ra>
// kernel: squeeze.4
= control target key start
LH: loop header
LB: loop body
LE: loop exit
PB: predicated region body
PF: predicated region fallthrough
CT: control target
= control target key end

     0   :  { %vm17_vm0 = vcmask 31744   ;;  %vm32_vm1 = vcmask 1045508   ;;  %s134_s0 = inlined_call_operand.vmem [shape: f32[2,3,8,1], index: 0, kind: input, shape index: {}]   ;;  %s135_s1 = inlined_call_operand.vmem [shape: f32[2,3,2,4], index: 1, kind: output, shape index: {}]  }
   0x1   :  { %v88_v0 = vld [vmem:[%s134_s0 + $0x4] sm:$0x3]  ;;  %v89_v1 = vld [vmem:[%s134_s0 + $0x2] sm:$0x3]  ;;  %v14_v2 = vld [vmem:[%s134_s0] sm:$0x3] }
   0x2   :  { %9 = vst [vmem:[#allocation1 + $0x10] sm:$0x3] %v88_v0  ;;  %13 = vst [vmem:[#allocation1 + $0x8] sm:$0x3] %v89_v1  ;;  %s96_s0 = smov 124  }
   0x3   :  { %15 = vst [vmem:[#allocation1] sm:$0x3] %v14_v2 }
   0x9   :  { %v20_v4 = vld [vmem:[#allocation1 + $0x8] sm:$0x3]   ;;  %v31_v5 = vld [vmem:[#allocation1 + $0xc] sm:$0x30]  }
   0xa   :  { %v16_v3 = vld [vmem:[#allocation1] sm:$0x3]   ;;  %23 = vst.msk [vmem:[#allocation0 + $0x10] ss:$8 sm:$0x3] %vm17_vm0, %v20_v4  }
   0xb   :  { %18 = vst.msk [vmem:[#allocation0] ss:$8 sm:$0x3] %vm17_vm0, %v16_v3   ;;  %v29_v6 = vld.sshfl [vmem:[#allocation1] sm:$0xff pattern:$0x99999810]  }
   0xc   :  { %v25_v7 = vld [vmem:[#allocation1 + $0x10] sm:$0x3]   ;;  %v33_v8 = vsel %vm32_vm1, %v31_v5, %v29_v6 }
   0xd   :  { %28 = vst.msk [vmem:[#allocation0 + $0x20] ss:$8 sm:$0x3] %vm17_vm0, %v25_v7   ;;  %34 = vrot.lane.b32.xlu0 %v33_v8, %s96_s0 }
  0x7f   :  { %v35_v9 = vpop.permute.xlu0 %34  }
  0x80   :  { %38 = vst.msk [vmem:[#allocation0 + $0x1] ss:$8 sm:$0xf] %vm17_vm0, %v35_v9   ;;  %40 = vst.msk [vmem:[#allocation0 + $0x1] ss:$8 sm:$0x30] %vm17_vm0, %v35_v9  }
  0x87   :  { %v70_v10 = vld [vmem:[#allocation0 + $0x20] sm:$0x3]  ;;  %v77_v11 = vld [vmem:[#allocation0 + $0x28] sm:$0x3]  ;;  %v56_v14 = vld [vmem:[#allocation0 + $0x10] sm:$0x3] }
  0x88   :  { %v45_v12 = vld [vmem:[#allocation0] sm:$0x3]  ;;  %93 = vst [vmem:[%s135_s1 + $0x8] sm:$0x3] %v70_v10  ;;  %94 = vst [vmem:[%s135_s1 + $0xa] sm:$0x3] %v77_v11 }
  0x89   :  { %48 = vst [vmem:[%s135_s1] sm:$0x3] %v45_v12  ;;  %v50_v13 = vld [vmem:[#allocation0 + $0x8] sm:$0x3]  ;;  %v63_v15 = vld [vmem:[#allocation0 + $0x18] sm:$0x3] }
  0x8a   :  { %90 = vst [vmem:[%s135_s1 + $0x2] sm:$0x3] %v50_v13  ;;  %91 = vst [vmem:[%s135_s1 + $0x4] sm:$0x3] %v56_v14 }
  0x8b   :  { %92 = vst [vmem:[%s135_s1 + $0x6] sm:$0x3] %v63_v15 }

// kernel: at_loss.1
= control target key start
LH: loop header
LB: loop body
LE: loop exit
PB: predicated region body
PF: predicated region fallthrough
CT: control target
= control target key end

     0   :  { %s463_s9 = smov 0   ;;  %s465_s10 = smov 0   ;;  %s516_s0 = inlined_call_operand.vmem [shape: f32[2,8,256], index: 0, kind: input, shape index: {}]   ;;  %s517_s1 = inlined_call_operand.vmem [shape: f32[2,8,256], index: 1, kind: input, shape index: {}]   ;;  %s518_s2 = inlined_call_operand.vmem [shape: f32[2,3,8,1], index: 2, kind: output, shape index: {}]  }
   0x1   :  { %s467_s11 = smov 0  }
   0x2 LB: > { %s27_s12 = sadd.s32 1, %s441_s10  ;;  %p383_p0 = scmp.ge.s32.totalorder %s445_s11, 1  ;;  %s445_s11 = sphi %s467_s11, %s12_s11   ;;  %s441_s10 = sphi %s465_s10, %s520_s10   ;;  %s437_s9 = sphi %s463_s9, %s519_s9  }
   0x3   : > { %p29_p1 = scmp.ge.s32.totalorder %s27_s12, 2  ;;  %p167_p2 = scmp.lt.s32.totalorder %s445_s11, 3 }
   0x5   : > { %s522_s12 = smov (%p29_p1, %s27_s12), 0  ;;  %p168_p3 = pnand %p383_p0, %p167_p2 }
   0x6   : > { %p208_p4 = scmp.lt.s32.totalorder (!%p168_p3), %s437_s9, 1 }
   0x7   : > { %171 = sbr.rel (%p168_p3) target bundleno = 167 (0xa7), region = 28 }
   0xc   : > { %s524_s9 = smov (!%p208_p4, %s437_s9), 1  ;;  %vm243_vm0 = vcmask 7168   ;;  %v447_v7 = vmov 0.0  }
   0xd   : > { %s395_s13 = sshll.u32 %s524_s9, 4  ;;  %s397_s14 = smul.u32 24, %s524_s9 }
   0xe   : > { %s227_s17 = scalar_lea.vmem %s517_s1, %s395_s13  ;;  %s215_s20 = scalar_lea.vmem %s516_s0, %s395_s13 }
   0xf   : > { %s490_s23 = scalar_lea.vmem %s518_s2, %s397_s14  ;;  %v247_v0 = vld [vmem:[%s227_s17] sm:$0xff]  ;;  %v248_v1 = vld [vmem:[%s227_s17 + $0x8] sm:$0xff] }
  0x10   : > { %v249_v2 = vld [vmem:[%s215_s20] sm:$0xff]  ;;  %v251_v3 = vmul.f32 %v247_v0, %v247_v0  ;;  %v252_v4 = vmul.f32 %v248_v1, %v248_v1  ;;  %v250_v5 = vld [vmem:[%s215_s20 + $0x8] sm:$0xff]  ;;  %244 = vst.msk [vmem:[%s490_s23] sm:$0xff] %vm243_vm0, %v447_v7  ;;  %245 = vst.msk [vmem:[%s490_s23 + $0x8] sm:$0xff] %vm243_vm0, %v447_v7 }
  0x11   : > { %v253_v6 = vmul.f32 %v249_v2, %v249_v2  ;;  %246 = vst.msk [vmem:[%s490_s23 + $0x10] sm:$0xff] %vm243_vm0, %v447_v7  ;;  %v254_v8 = vmul.f32 %v250_v5, %v250_v5 }
  0x12   : > { %v255_v9 = vmul.f32 %v251_v3, %v251_v3  ;;  %v256_v10 = vmul.f32 %v252_v4, %v252_v4 }
  0x13   : > { %v273_v11 = vmul.f32 %v253_v6, %v251_v3  ;;  %v257_v12 = vmul.f32 %v253_v6, %v253_v6  ;;  %v274_v13 = vmul.f32 %v254_v8, %v252_v4  ;;  %v258_v14 = vmul.f32 %v254_v8, %v254_v8 }
  0x14   : > { %v260_v15 = vadd.f32 %v256_v10, %v255_v9 }
  0x15   : > { %v277_v16 = vadd.f32 %v274_v13, %v273_v11  ;;  %v268_v17 = vadd.f32 %v258_v14, %v257_v12 }
  0x16   : > { %261 = vadd.xlane.f32.xlu0 %v260_v15 }
  0x17   : > { %278 = vadd.xlane.f32.xlu1 %v277_v16  ;;  %v259_v18 = vld [vmem:[%s490_s23] sm:$0xff]  ;;  %v389_v24 = vld [vmem:[%s490_s23 + $0x8] sm:$0xff] }
  0x18   : > { %v391_v19 = vld [vmem:[%s490_s23 + $0x10] sm:$0xff] }
  0x1a   : > { %269 = vadd.xlane.f32.xlu0 %v268_v17 }
  0x9f   : > { %v262_v20 = vpop.xlane.xlu0 %261 }
  0xa0   : > { %v263_v21 = vadd.f32 %v262_v20, %v259_v18  ;;  %v279_v22 = vpop.xlane.xlu1 %278 }
  0xa1   : > { %v280_v23 = vadd.f32 %v391_v19, %v279_v22 }
  0xa2   : > { %265 = vst.msk [vmem:[%s490_s23] sm:$0xff] %vm243_vm0, %v263_v21 }
  0xa3   : > { %392 = vst.msk [vmem:[%s490_s23 + $0x10] sm:$0xff] %vm243_vm0, %v280_v23  ;;  %v270_v25 = vpop.xlane.xlu0 %269 }
  0xa4   : > { %v271_v26 = vadd.f32 %v389_v24, %v270_v25 }
  0xa6   : > { %390 = vst.msk [vmem:[%s490_s23 + $0x8] sm:$0xff] %vm243_vm0, %v271_v26 }
  0xa7 PF: > { %s12_s11 = sadd.s32 1, %s445_s11   ;;  %s519_s9 = smov %s441_s10 }
  0xa8   : > { %p9_p5 = scmp.ge.s32.totalorder %s12_s11, 4   ;;  %s520_s10 = smov %s522_s12 }
  0xaa   :  { %11 = sbr.rel (!%p9_p5) target bundleno = 2 (0x2), region = 67 }

</bundles_post_ra>
